<compile_context>
chip_gen: v6e
topology: v6e:2x2x1
jax: 0.10.0
libtpu: 0.0.40
codegen_flags: <defaults>
</compile_context>

<pallas_src>
import functools

import jax
import jax.numpy as jnp
from jax import lax
from jax.experimental import pallas as pl
from jax.experimental.pallas import tpu as pltpu


# Minimum legal sublane multiple of a (rows, C) block per element size.
_SUBLANE_MULT = {4: 8, 2: 16, 1: 32}


def _vmem_capacity_bytes():
    try:
        return int(pltpu.get_tpu_info().vmem_capacity_bytes)
    except Exception:
        return 64 * 1024 * 1024  # conservative (v7x-sized) assumption


def _choose_tile_n(n, c, itemsize):
    vmem = _vmem_capacity_bytes()
    # ~4 MiB of f32 logits per tile on 64 MiB-VMEM chips (v7x), ~8 MiB on
    # 128 MiB chips (v5e/v6e).  Total working set is ~7-8x this after the live
    # f32 temporaries plus double-buffered native-dtype input blocks.
    budget = 8 * 1024 * 1024 if vmem >= 100 * 1024 * 1024 else 4 * 1024 * 1024
    mult = _SUBLANE_MULT.get(itemsize, 8)
    tn = min(1024, max(mult, budget // (c * 4)))
    tn = max(mult, (tn // mult) * mult)
    if n <= tn:
        return n  # single tile: block == full batch dim (always legal)
    return tn


def _vmem_limit_bytes(tile_n, c, itemsize):
    # Derive the scoped-VMEM request from the actual tile working set:
    # double-buffered native-dtype logits blocks + target blocks (lane-padded)
    # + ~6 live (TN,C) f32 temporaries + the two (8,128) output buffers.
    inputs = 2 * tile_n * c * itemsize
    targets = 2 * tile_n * 128 * 4
    temps = 6 * tile_n * c * 4
    outputs = 2 * 8 * 128 * 4
    est = inputs + targets + temps + outputs
    cap = _vmem_capacity_bytes()
    return int(min(int(0.75 * cap), max(8 * 1024 * 1024, 2 * est)))


def _ce_smooth_kernel(logits_ref, target_ref, out_ref, *, classes_num, eps,
                      batch, tile_n, ragged):
    # logits_ref: (TN, C) native dtype; target_ref: (TN, 1) int32;
    # out_ref: (8, 128) f32 lane-dense per-tile partial-sum block.
    x = logits_ref[...].astype(jnp.float32)                        # (TN, C)
    tn, c = x.shape

    # Row max on XLU; everything below is row-local (padded-row garbage, if
    # any, never leaks across rows and is masked out of loss_rows at the end).
    m = jnp.max(x, axis=1, keepdims=True)                          # (TN, 1)
    z = x - m                                                      # (TN, C)

    # Smoothed target distribution q (sum_j q_j == 1), fused with z in a single
    # weighted reduction:  loss_i = lse_i - sum_j q_j * z_j.
    tgt = target_ref[...]                                          # (TN, 1) int32
    cls_idx = lax.broadcasted_iota(jnp.int32, (tn, c), 1)          # (TN, C)
    uni = eps / classes_num
    q = jnp.where(cls_idx == tgt, (1.0 - eps) + uni, uni)          # (TN, C)

    # Row sums via the (otherwise idle) MXU instead of XLU lane reductions.
    ones_c = jnp.ones((c, 1), jnp.float32)
    sum_exp = jnp.dot(jnp.exp(z), ones_c,
                      preferred_element_type=jnp.float32)          # (TN, 1)
    qz = jnp.dot(q * z, ones_c,
                 preferred_element_type=jnp.float32)               # (TN, 1)

    loss_rows = jnp.log(sum_exp) - qz                              # (TN, 1)

    if ragged:
        # Only the last tile pays for the row mask (static gating).
        i = pl.program_id(0)
        last = pl.num_programs(0) - 1

        @pl.when(i == last)
        def _():
            row = lax.broadcasted_iota(jnp.int32, (tn, 1), 0)
            valid = (i * tile_n + row) < batch
            s = jnp.sum(jnp.where(valid, loss_rows, 0.0))
            out_ref[...] = jnp.full(out_ref.shape, s, dtype=jnp.float32)

        @pl.when(i != last)
        def _():
            out_ref[...] = jnp.full(out_ref.shape, jnp.sum(loss_rows),
                                    dtype=jnp.float32)
    else:
        out_ref[...] = jnp.full(out_ref.shape, jnp.sum(loss_rows),
                                dtype=jnp.float32)


def cross_entropy_smooth(logits, target, classes_num, eps=0.1, tile_n=None):
    """logits: (N, C) float (any dtype), target: (N,) int. Returns scalar f32 loss."""
    n, c = logits.shape
    assert c == classes_num
    target2d = target.astype(jnp.int32).reshape(n, 1)

    itemsize = jnp.dtype(logits.dtype).itemsize
    mult = _SUBLANE_MULT.get(itemsize, 8)

    if tile_n is None:
        tile_n = _choose_tile_n(n, c, itemsize)
    else:
        # Enforce the dtype's minimum sublane multiple on user-supplied tiles
        # (bf16 needs 16 rows, int8/fp8 need 32) unless the block spans the
        # whole batch dim.
        tile_n = max(mult, ((tile_n + mult - 1) // mult) * mult)
    if tile_n >= n:
        tile_n = n

    num_tiles = -(-n // tile_n)
    ragged = (n % tile_n) != 0

    kernel = functools.partial(
        _ce_smooth_kernel,
        classes_num=classes_num, eps=float(eps), batch=n, tile_n=tile_n,
        ragged=ragged,
    )

    partials = pl.pallas_call(
        kernel,
        out_shape=jax.ShapeDtypeStruct((num_tiles * 8, 128), jnp.float32),
        grid=(num_tiles,),
        in_specs=[
            pl.BlockSpec((tile_n, c), lambda i: (i, 0)),   # logits tile (native dtype)
            pl.BlockSpec((tile_n, 1), lambda i: (i, 0)),   # target tile
        ],
        out_specs=pl.BlockSpec((8, 128), lambda i: (i, 0)),
        compiler_params=pltpu.CompilerParams(
            # "parallel" shards batch tiles across TensorCores on multi-TC
            # chips; if a v7x profile shows a single busy TC, switch this to
            # (pltpu.CORE_PARALLEL,).
            dimension_semantics=("parallel",),
            vmem_limit_bytes=_vmem_limit_bytes(tile_n, c, itemsize),
        ),
    )(logits, target2d)

    # All 8*128 elements of each tile block carry the same partial sum:
    # dense lane-friendly reduction, one divide at the end.
    return jnp.sum(partials) * (1.0 / (8.0 * 128.0 * n))


def _reference(logits, target, classes_num, eps):
    log_p = jax.nn.log_softmax(logits.astype(jnp.float32), axis=1)
    place = jax.nn.one_hot(target, classes_num, dtype=jnp.float32)
    qi = (1.0 - eps) * place + eps / classes_num
    return jnp.sum(jnp.mean(-qi * log_p, axis=0))


if __name__ == "__main__":
    key = jax.random.PRNGKey(0)
    eps = 0.1
    # Tolerance note: row reductions go through the MXU; for f32 operands the
    # matmul pass count is backend-chosen, so allow ~0.5% slack.
    ATOL, RTOL = 5e-3, 5e-3

    # Case 1: small lane-aligned f32 case, single tile (no masking path).
    k1, k2 = jax.random.split(key)
    N, C = 8, 128
    logits = jax.random.normal(k1, (N, C), dtype=jnp.float32)
    target = jax.random.randint(k2, (N,), 0, C, dtype=jnp.int32)
    loss = jax.block_until_ready(cross_entropy_smooth(logits, target, C, eps))
    ref = _reference(logits, target, C, eps)
    assert jnp.allclose(loss, ref, atol=ATOL, rtol=RTOL), ("case1", loss, ref)

    # Case 2: multi-tile f32 with a ragged last tile (N=20, TN=8 -> 3 tiles,
    # 4 masked rows; exercises the @pl.when last-tile mask path).
    k3, k4 = jax.random.split(k2)
    N2, C2 = 20, 128
    logits2 = jax.random.normal(k3, (N2, C2), dtype=jnp.float32)
    target2 = jax.random.randint(k4, (N2,), 0, C2, dtype=jnp.int32)
    loss2 = jax.block_until_ready(
        cross_entropy_smooth(logits2, target2, C2, eps, tile_n=8))
    ref2 = _reference(logits2, target2, C2, eps)
    assert jnp.allclose(loss2, ref2, atol=ATOL, rtol=RTOL), ("case2", loss2, ref2)

    # Case 3: bf16 logits DMA'd in native dtype; user tile_n=8 is rounded up to
    # the bf16-legal 16 rows -> 2 tiles with a ragged last tile.
    logits3 = logits2.astype(jnp.bfloat16)
    loss3 = jax.block_until_ready(
        cross_entropy_smooth(logits3, target2, C2, eps, tile_n=8))
    ref3 = _reference(logits3, target2, C2, eps)
    assert jnp.allclose(loss3, ref3, atol=ATOL, rtol=RTOL), ("case3", loss3, ref3)

    # Case 4: default (auto) tile sizing path.
    loss4 = jax.block_until_ready(cross_entropy_smooth(logits2, target2, C2, eps))
    assert jnp.allclose(loss4, ref2, atol=ATOL, rtol=RTOL), ("case4", loss4, ref2)

    print("KERNEL_OK")
</pallas_src>

<mosaic_0001>
module attributes {stable_mosaic.version = 11 : i64} {
  func.func @_ce_smooth_kernel(%arg0: i32, %arg1: memref<8x128xf32, #tpu.memory_space<vmem>>, %arg2: memref<8x1xi32, #tpu.memory_space<vmem>>, %arg3: memref<8x128xf32, #tpu.memory_space<vmem>>) attributes {dimension_semantics = [#tpu.dimension_semantics<parallel>], iteration_bounds = array<i64: 1>, scalar_prefetch = 0 : i64, scratch_operands = 0 : i64, tpu.core_type = #tpu.core_type<tc>, window_params = [{transform_indices = @transform_0, window_bounds = array<i64: 8, 128>}, {transform_indices = @transform_1, window_bounds = array<i64: 8, 1>}, {transform_indices = @transform_2, window_bounds = array<i64: 8, 128>}]} {
    %c0 = arith.constant 0 : index
    %c0_0 = arith.constant 0 : index
    %0 = vector.load %arg1[%c0, %c0_0] : memref<8x128xf32, #tpu.memory_space<vmem>>, vector<8x128xf32>
    %cst = arith.constant dense<0xFF800000> : vector<8xf32>
    %1 = vector.multi_reduction <maximumf>, %0, %cst [1] : vector<8x128xf32> to vector<8xf32>
    %2 = vector.shape_cast %1 : vector<8xf32> to vector<8x1xf32>
    %3 = vector.broadcast %2 : vector<8x1xf32> to vector<8x128xf32>
    %4 = arith.subf %0, %3 : vector<8x128xf32>
    %c0_1 = arith.constant 0 : index
    %c0_2 = arith.constant 0 : index
    %5 = vector.load %arg2[%c0_1, %c0_2] : memref<8x1xi32, #tpu.memory_space<vmem>>, vector<8x1xi32>
    %6 = tpu.iota {dimensions = array<i32: 1>} : vector<8x128xi32>
    %7 = vector.broadcast %5 : vector<8x1xi32> to vector<8x128xi32>
    %8 = arith.cmpi eq, %6, %7 : vector<8x128xi32>
    %cst_3 = arith.constant 0.900781273 : f32
    %cst_4 = arith.constant 7.812500e-04 : f32
    %9 = vector.broadcast %cst_3 : f32 to vector<8x128xf32>
    %10 = vector.broadcast %cst_4 : f32 to vector<8x128xf32>
    %11 = arith.select %8, %9, %10 : vector<8x128xi1>, vector<8x128xf32>
    %cst_5 = arith.constant 1.000000e+00 : f32
    %12 = vector.broadcast %cst_5 : f32 to vector<128x1xf32>
    %13 = math.exp %4 : vector<8x128xf32>
    %cst_6 = arith.constant dense<0.000000e+00> : vector<8x1xf32>
    %14 = tpu.matmul %13, %12, %cst_6 {dimension_numbers = #tpu.dot_dimension_numbers<[1], [0], [0], [1], [0, 0, 1, 1], [], []>} : vector<8x128xf32>, vector<128x1xf32>, vector<8x1xf32> -> vector<8x1xf32>
    %15 = arith.mulf %11, %4 : vector<8x128xf32>
    %cst_7 = arith.constant dense<0.000000e+00> : vector<8x1xf32>
    %16 = tpu.matmul %15, %12, %cst_7 {dimension_numbers = #tpu.dot_dimension_numbers<[1], [0], [0], [1], [0, 0, 1, 1], [], []>} : vector<8x128xf32>, vector<128x1xf32>, vector<8x1xf32> -> vector<8x1xf32>
    %17 = math.log %14 : vector<8x1xf32>
    %18 = arith.subf %17, %16 : vector<8x1xf32>
    %19 = vector.shape_cast %18 : vector<8x1xf32> to vector<1x8x1xf32>
    %cst_8 = arith.constant dense<0.000000e+00> : vector<1xf32>
    %20 = vector.multi_reduction <add>, %19, %cst_8 [1, 2] : vector<1x8x1xf32> to vector<1xf32>
    %21 = vector.shape_cast %20 : vector<1xf32> to vector<1x1x1xf32>
    %22 = vector.extract %21[0, 0, 0] : f32 from vector<1x1x1xf32>
    %23 = vector.broadcast %22 : f32 to vector<8x128xf32>
    %c0_9 = arith.constant 0 : index
    %c0_10 = arith.constant 0 : index
    %24 = vector.load %arg3[%c0_9, %c0_10] : memref<8x128xf32, #tpu.memory_space<vmem>>, vector<8x128xf32>
    tpu.vector_store %arg3[%c0_9, %c0_10], %23 {strides = array<i32>} : memref<8x128xf32, #tpu.memory_space<vmem>>, vector<8x128xf32>,
    return
  }
  func.func @transform_0(%arg0: i32) -> (i32, i32) {
    %c0_i32 = arith.constant 0 : i32
    %c0_i32_0 = arith.constant 0 : i32
    return %arg0, %c0_i32 : i32, i32
  }
  func.func @transform_1(%arg0: i32) -> (i32, i32) {
    %c0_i32 = arith.constant 0 : i32
    %c0_i32_0 = arith.constant 0 : i32
    return %arg0, %c0_i32 : i32, i32
  }
  func.func @transform_2(%arg0: i32) -> (i32, i32) {
    %c0_i32 = arith.constant 0 : i32
    %c0_i32_0 = arith.constant 0 : i32
    return %arg0, %c0_i32 : i32, i32
  }
}

</mosaic_0001>

<bundles_post_ra>
// kernel: tpu_custom_call.1
= control target key start
LH: loop header
LB: loop body
LE: loop exit
PB: predicated region body
PF: predicated region fallthrough
CT: control target
= control target key end

     0   :  { %v336_v1 = vmov 0.0   ;;  %s436_s0 = inlined_call_operand.vmem [shape: f32[8,128], index: 0, kind: input, shape index: {}]   ;;  %s437_s1 = inlined_call_operand.vmem [shape: s32[8,1], index: 1, kind: input, shape index: {}]   ;;  %s438_s2 = inlined_call_operand.hbm [shape: f32[8,128], index: 2, kind: output, shape index: {}]  }
   0x1   :  { %v360_v0 = vld [vmem:[%s436_s0] sm:$0xff]  ;;  %266 = vmatprep.subr.mxu1 %v336_v1 }
   0x2   :  { %13 = vmax.xlane.f32.xlu0 %v360_v0 }
   0x3   :  { %7 = vsyncpa [#allocation3], 0  ;;  %v337_v2 = vmov 0   ;;  %v338_v3 = vmov 1.0   ;;  %231 = vmatprep.subr.mxu0 %v336_v1  ;;  %v16_v4 = vld [vmem:[%s437_s1] sm:$0xff]  ;;  %vm339_vm0 = vmmov 0   ;;  %v17_v7 = vlaneseq }
   0x4   :  { %309 = vset.pattern.permute.xlu0 %v337_v2  ;;  %267 = vmatpush3.msra.mxu1 %v338_v3  ;;  %v340_v11 = vmov 0.00078125   ;;  %vm170_vm2 = vcmask 7168   ;;  %s341_s1 = smov [#allocation2]  }
   0x5   :  { %268 = vmatprep.subr.mxu1 %v336_v1  ;;  %232 = vmatpush3.msra.mxu0 %v338_v3  ;;  %v18_v9 = vand.u32 127, %v17_v7  ;;  %s189_s12 = sshll.u32 %s341_s1, 4  ;;  %s190_s12 = int_to_ptr.vmem [resolvable:$true] %s189_s12 }
   0x6   :  { %269 = vmatpush3.msra.mxu1 %v338_v3  ;;  %233 = vmatprep.subr.mxu0 %v336_v1  ;;  %s314_s14 = scalar_lea.vmem %s190_s12, 128  ;;  %p319_p1 = scmp.lt.s32.totalorder %s190_s12, %s190_s12 }
   0x7   :  { %270 = vmatprep.subr.mxu1 %v336_v1  ;;  %234 = vmatpush3.msra.mxu0 %v338_v3  ;;  %p315_p0 = scmp.ne.s32.totalorder %s190_s12, %s314_s14  ;;  %p320_p2 = scmp.lt.s32.totalorder %s314_s14, %s314_s14 }
   0x8   :  { %271 = vmatpush3.msra.mxu1 %v338_v3  ;;  %235 = vmatprep.subr.mxu0 %v336_v1 }
   0x9   :  { %272 = vmatprep.subr.mxu1 %v336_v1  ;;  %236 = vmatpush3.msra.mxu0 %v338_v3  ;;  %p321_p3 = por %p320_p2, %p319_p1 }
   0xa   :  { %273 = vmatpush3.msra.mxu1 %v338_v3  ;;  %237 = vmatprep.subr.mxu0 %v336_v1 }
   0xb   :  { %274 = vmatprep.subr.mxu1 %v336_v1  ;;  %238 = vmatpush3.msra.mxu0 %v338_v3  ;;  %p322_p4 = pnand %p321_p3, %p315_p0 }
   0xc   :  { %275 = vmatpush3.msra.mxu1 %v338_v3  ;;  %239 = vmatprep.subr.mxu0 %v336_v1 }
   0xd   :  { %276 = vmatprep.subr.mxu1 %v336_v1  ;;  %240 = vmatpush3.msra.mxu0 %v338_v3 }
   0xe   :  { %277 = vmatpush3.msra.mxu1 %v338_v3  ;;  %241 = vmatprep.subr.mxu0 %v336_v1 }
   0xf   :  { %278 = vmatprep.subr.mxu1 %v336_v1  ;;  %242 = vmatpush3.msra.mxu0 %v338_v3 }
  0x10   :  { %279 = vmatpush3.msra.mxu1 %v338_v3  ;;  %243 = vmatprep.subr.mxu0 %v336_v1 }
  0x11   :  { %280 = vmatprep.subr.mxu1 %v336_v1  ;;  %244 = vmatpush3.msra.mxu0 %v338_v3 }
  0x12   :  { %281 = vmatpush3.msra.mxu1 %v338_v3  ;;  %245 = vmatprep.subr.mxu0 %v336_v1 }
  0x13   :  { %282 = vmatprep.subr.mxu1 %v336_v1  ;;  %246 = vmatpush3.msra.mxu0 %v338_v3 }
  0x14   :  { %283 = vmatpush3.msra.mxu1 %v338_v3  ;;  %247 = vmatprep.subr.mxu0 %v336_v1 }
  0x15   :  { %284 = vmatprep.subr.mxu1 %v336_v1  ;;  %248 = vmatpush3.msra.mxu0 %v338_v3 }
  0x16   :  { %285 = vmatpush3.msra.mxu1 %v338_v3  ;;  %249 = vmatprep.subr.mxu0 %v336_v1 }
  0x17   :  { %286 = vmatprep.subr.mxu1 %v336_v1  ;;  %250 = vmatpush3.msra.mxu0 %v338_v3 }
  0x18   :  { %287 = vmatpush3.msra.mxu1 %v338_v3  ;;  %20 = vperm.xlu0 %309, %v16_v4  }
  0x19   :  { %288 = vmatprep.subr.mxu1 %v336_v1  ;;  %251 = vmatprep.subr.mxu0 %v336_v1 }
  0x1a   :  { %289 = vmatpush3.msra.mxu1 %v338_v3  ;;  %252 = vmatpush3.msra.mxu0 %v338_v3 }
  0x1b   :  { %290 = vmatprep.subr.mxu1 %v336_v1  ;;  %253 = vmatprep.subr.mxu0 %v336_v1 }
  0x1c   :  { %291 = vmatpush3.msra.mxu1 %v338_v3  ;;  %254 = vmatpush3.msra.mxu0 %v338_v3 }
  0x1d   :  { %292 = vmatprep.subr.mxu1 %v336_v1  ;;  %255 = vmatprep.subr.mxu0 %v336_v1 }
  0x1e   :  { %293 = vmatpush3.msra.mxu1 %v338_v3  ;;  %256 = vmatpush3.msra.mxu0 %v338_v3 }
  0x1f   :  { %294 = vmatprep.subr.mxu1 %v336_v1  ;;  %298 = vmatprep.mubr.msk.f32.mxu1 %vm339_vm0, %v336_v1 }
  0x20   :  { %295 = vmatpush3.msra.mxu1 %v338_v3  ;;  %257 = vmatprep.subr.mxu0 %v336_v1 }
  0x21   :  { %296 = vmatprep.subr.mxu1 %v336_v1  ;;  %258 = vmatpush3.msra.mxu0 %v338_v3 }
  0x22   :  { %297 = vmatpush3.msra.mxu1 %v338_v3  ;;  %259 = vmatprep.subr.mxu0 %v336_v1 }
  0x23   :  { %263 = vmatprep.mubr.msk.f32.mxu0 %vm339_vm0, %v336_v1  ;;  %260 = vmatpush3.msra.mxu0 %v338_v3 }
  0x24   :  { %261 = vmatprep.subr.mxu0 %v336_v1 }
  0x25   :  { %262 = vmatpush3.msra.mxu0 %v338_v3 }
  0x8b   :  { %v14_v5 = vpop.xlane.xlu0 %13 }
  0x8c   :  { %v15_v6 = vsub.f32 %v360_v0, %v14_v5 }
  0x8e   :  { %v24_v8 = vmul.f32 1.442695, %v15_v6 }
  0x90   :  { %310 = vpow2.f32 %v24_v8 }
  0x93   :  { %v21_v10 = vpop.permute.xlu0 %20 }
  0x94   :  { %vm22_vm1 = vcmp.eq.s32.totalorder %v18_v9, %v21_v10 }
  0x95   :  { %v23_v12 = vsel %vm22_vm1, 0.9007813, %v340_v11 }
  0x96   :  { %v96_v13 = vmul.f32 %v23_v12, %v15_v6 }
  0x98   :  { %299 = vmatmul.mubr.f32.vlgmr.msra.gmra.mxu1 %v96_v13 }
  0x9d   :  { %v311_v14 = vpop.eup %310 }
  0x9e   :  { %264 = vmatmul.mubr.f32.vlgmr.msra.gmra.mxu0 %v311_v14 }
 0x158   :  { %v163_v15 = vpop.f32.mrf.mxu1 }
 0x15a   :  { %v300_v16 = vpop.f32.mrf.mxu1 }
 0x15e   :  { %v92_v17 = vpop.f32.mrf.mxu0 }
 0x15f   :  { %312 = vlog2.f32 %v92_v17 }
 0x160   :  { %v265_v18 = vpop.f32.mrf.mxu0 }
 0x16c   :  { %v313_v19 = vpop.eup %312 }
 0x16d   :  { %v168_v20 = vmul.f32 0.6931472, %v313_v19 }
 0x16f   :  { %v169_v21 = vsub.f32 %v168_v20, %v163_v15 }
 0x171   :  { %v171_v22 = vsel %vm170_vm2, %v169_v21, 0.0 }
 0x172   :  { %172 = vadd.xlane.f32.xlu1 %v171_v22 }
 0x1fb   :  { %v173_v23 = vpop.xlane.xlu1 %172 }
 0x1fc   :  { %v174_v24 = vrot.slane %v173_v23, 4 }
 0x1fe   :  { %v175_v25 = vadd.f32 %v174_v24, %v173_v23 }
 0x200   :  { %v176_v26 = vrot.slane %v175_v25, 2 }
 0x202   :  { %v177_v27 = vadd.f32 %v176_v26, %v175_v25 }
 0x204   :  { %v178_v28 = vrot.slane %v177_v27, 1 }
 0x206   :  { %v179_v29 = vadd.f32 %v178_v28, %v177_v27 }
 0x208   :  { %301 = vpush %v179_v29 }
 0x239   :  { %s302_s13 = spop %301 }
 0x23a   :  { %v181_v30 = vstv %s302_s13 }
 0x23b   :  { %182 = vst [vmem:[#allocation2] sm:$0xff] %v181_v30 }
 0x23c   :  { %325 = shalt.err (!%p322_p4)
}
 0x23d   :  { %192 = dma.vmem_to_hbm [thread:$0]  %s190_s12, 128, %s438_s2, [#allocation3]  }
 0x23e   :  { %334 = dma.done.wait [#allocation3], 128  }
 0x23f   :  { %335 = vsyncadd [#allocation3], 4294967168 }
 0x240   :  { %196 = vsyncpa [#allocation3], 1 }

</bundles_post_ra>
